<compile_context>
chip_gen: v5e
topology: v5e:2x2
jax: 0.10.0
libtpu: 0.0.40
codegen_flags: <defaults>
</compile_context>

<pallas_src>
import jax
import jax.numpy as jnp
from jax.experimental import pallas as pl
from jax.experimental.pallas import tpu as pltpu


def _round_up(n, m):
    return ((n + m - 1) // m) * m


def mlp_kernel(x_ref, w1_ref, b1_ref, w2_ref, b2_ref, w3_ref, b3_ref, o_ref):
    """Fused forward: out(relu(fc2(relu(fc1(x))))) with batch on the lane axis.

    x_ref : (2, TB)     w1_ref: (10, 2)   b1_ref: (10, 1)
                        w2_ref: (10, 10)  b2_ref: (10, 1)
                        w3_ref: (1, 10)   b3_ref: (1, 1)
    o_ref : (1, TB)
    """
    x = x_ref[...]          # (2, TB)
    w1 = w1_ref[...]        # (10, 2)
    w2 = w2_ref[...]        # (10, 10)
    w3 = w3_ref[...]        # (1, 10)

    # fc1: K=2 -> two-term VPU FMA chain, no MXU.
    h1 = w1[:, 0:1] * x[0:1, :] + w1[:, 1:2] * x[1:2, :] + b1_ref[...]   # (10, TB)
    h1 = jnp.maximum(h1, 0.0)                                            # ReLU

    # fc2: K=10 -> unrolled 10-term FMA chain.
    h2 = jnp.broadcast_to(b2_ref[...], h1.shape)                         # (10, TB)
    for k in range(w2.shape[1]):
        h2 = h2 + w2[:, k:k + 1] * h1[k:k + 1, :]
    h2 = jnp.maximum(h2, 0.0)                                            # ReLU

    # out: K=10 -> unrolled 10-term FMA chain, lane-dense (1, TB) result.
    y = jnp.broadcast_to(b3_ref[...], (1, h2.shape[1]))                  # (1, TB)
    for k in range(w3.shape[1]):
        y = y + w3[:, k:k + 1] * h2[k:k + 1, :]

    o_ref[...] = y.astype(o_ref.dtype)                                   # full-width vst


def mlp_forward(x, params, *, block_b=512):
    """x: (B, 2) float32  ->  (B, 1) float32 (same semantics as the PyTorch model)."""
    w1, b1, w2, b2, w3, b3 = params
    B = x.shape[0]

    # Batch tile on the lane axis: multiple of 128, up to `block_b`.
    tb = min(block_b, _round_up(max(B, 1), 128))
    b_pad = _round_up(B, tb)

    # Wrapper-side layout change: batch -> lanes.
    xt = jnp.transpose(x)                                   # (2, B)
    if b_pad != B:
        xt = jnp.pad(xt, ((0, 0), (0, b_pad - B)))          # (2, B_pad)

    grid = (b_pad // tb,)
    full = lambda a: pl.BlockSpec(a.shape, lambda i: (0, 0))  # VMEM-resident params

    out = pl.pallas_call(
        mlp_kernel,
        out_shape=jax.ShapeDtypeStruct((1, b_pad), jnp.float32),
        grid=grid,
        in_specs=[
            pl.BlockSpec((2, tb), lambda i: (0, i)),   # x tile: batch on lanes
            full(w1), full(b1),
            full(w2), full(b2),
            full(w3), full(b3),
        ],
        out_specs=pl.BlockSpec((1, tb), lambda i: (0, i)),
        compiler_params=pltpu.CompilerParams(
            dimension_semantics=("parallel",),          # megacore on v7x
        ),
    )(xt, w1, b1, w2, b2, w3, b3)

    return jnp.transpose(out[:, :B])                    # (B, 1)


def init_params(key):
    """Deterministic init mirroring nn.Linear's U(-1/sqrt(fan_in), 1/sqrt(fan_in)).

    Weights kept in PyTorch (out_features, in_features) layout; biases stored as
    (out_features, 1) columns so they broadcast over the lane (batch) axis.
    """
    def linear(key, fan_in, fan_out):
        kw, kb = jax.random.split(key)
        bound = 1.0 / jnp.sqrt(jnp.float32(fan_in))
        w = jax.random.uniform(kw, (fan_out, fan_in), jnp.float32, -bound, bound)
        b = jax.random.uniform(kb, (fan_out, 1), jnp.float32, -bound, bound)
        return w, b

    k1, k2, k3 = jax.random.split(key, 3)
    w1, b1 = linear(k1, 2, 10)
    w2, b2 = linear(k2, 10, 10)
    w3, b3 = linear(k3, 10, 1)
    return w1, b1, w2, b2, w3, b3


def reference_forward(x, params):
    """Pure-JAX reference with identical semantics (PyTorch weight layout)."""
    w1, b1, w2, b2, w3, b3 = params
    h1 = jnp.maximum(x @ w1.T + b1.T, 0.0)
    h2 = jnp.maximum(h1 @ w2.T + b2.T, 0.0)
    return h2 @ w3.T + b3.T


if __name__ == "__main__":
    key = jax.random.PRNGKey(0)
    kx, kp = jax.random.split(key)

    batch = 200  # small; non-multiple of 128 to exercise lane padding
    x = jax.random.normal(kx, (batch, 2), jnp.float32)   # 2 input features (circles)
    params = init_params(kp)

    y = mlp_forward(x, params)
    y = jax.block_until_ready(y)

    y_ref = reference_forward(x, params)
    assert y.shape == (batch, 1)
    assert jnp.allclose(y, y_ref, atol=1e-5, rtol=1e-5), "mismatch vs reference"

    print("KERNEL_OK")
</pallas_src>

<mosaic_0001>
module attributes {stable_mosaic.version = 11 : i64} {
  func.func @mlp_kernel(%arg0: i32, %arg1: memref<2x256xf32, #tpu.memory_space<vmem>>, %arg2: memref<10x2xf32, #tpu.memory_space<vmem>>, %arg3: memref<10x1xf32, #tpu.memory_space<vmem>>, %arg4: memref<10x10xf32, #tpu.memory_space<vmem>>, %arg5: memref<10x1xf32, #tpu.memory_space<vmem>>, %arg6: memref<1x10xf32, #tpu.memory_space<vmem>>, %arg7: memref<1x1xf32, #tpu.memory_space<vmem>>, %arg8: memref<1x256xf32, #tpu.memory_space<vmem>>) attributes {dimension_semantics = [#tpu.dimension_semantics<parallel>], iteration_bounds = array<i64: 1>, scalar_prefetch = 0 : i64, scratch_operands = 0 : i64, tpu.core_type = #tpu.core_type<tc>, window_params = [{transform_indices = @transform_0, window_bounds = array<i64: 2, 256>}, {pipeline_mode = #tpu.pipeline_mode<synchronous>, transform_indices = @transform_1, window_bounds = array<i64: 10, 2>}, {pipeline_mode = #tpu.pipeline_mode<synchronous>, transform_indices = @transform_2, window_bounds = array<i64: 10, 1>}, {pipeline_mode = #tpu.pipeline_mode<synchronous>, transform_indices = @transform_3, window_bounds = array<i64: 10, 10>}, {pipeline_mode = #tpu.pipeline_mode<synchronous>, transform_indices = @transform_4, window_bounds = array<i64: 10, 1>}, {pipeline_mode = #tpu.pipeline_mode<synchronous>, transform_indices = @transform_5, window_bounds = array<i64: 1, 10>}, {pipeline_mode = #tpu.pipeline_mode<synchronous>, transform_indices = @transform_6, window_bounds = array<i64: 1, 1>}, {transform_indices = @transform_7, window_bounds = array<i64: 1, 256>}]} {
    %c0 = arith.constant 0 : index
    %c0_0 = arith.constant 0 : index
    %0 = vector.load %arg1[%c0, %c0_0] : memref<2x256xf32, #tpu.memory_space<vmem>>, vector<2x256xf32>
    %c0_1 = arith.constant 0 : index
    %c0_2 = arith.constant 0 : index
    %1 = vector.load %arg2[%c0_1, %c0_2] : memref<10x2xf32, #tpu.memory_space<vmem>>, vector<10x2xf32>
    %c0_3 = arith.constant 0 : index
    %c0_4 = arith.constant 0 : index
    %2 = vector.load %arg4[%c0_3, %c0_4] : memref<10x10xf32, #tpu.memory_space<vmem>>, vector<10x10xf32>
    %c0_5 = arith.constant 0 : index
    %c0_6 = arith.constant 0 : index
    %3 = vector.load %arg6[%c0_5, %c0_6] : memref<1x10xf32, #tpu.memory_space<vmem>>, vector<1x10xf32>
    %4 = vector.extract_strided_slice %1 {offsets = [0, 0], sizes = [10, 1], strides = [1, 1]} : vector<10x2xf32> to vector<10x1xf32>
    %5 = vector.extract_strided_slice %0 {offsets = [0, 0], sizes = [1, 256], strides = [1, 1]} : vector<2x256xf32> to vector<1x256xf32>
    %6 = vector.broadcast %4 : vector<10x1xf32> to vector<10x256xf32>
    %7 = vector.broadcast %5 : vector<1x256xf32> to vector<10x256xf32>
    %8 = arith.mulf %6, %7 : vector<10x256xf32>
    %9 = vector.extract_strided_slice %1 {offsets = [0, 1], sizes = [10, 1], strides = [1, 1]} : vector<10x2xf32> to vector<10x1xf32>
    %10 = vector.extract_strided_slice %0 {offsets = [1, 0], sizes = [1, 256], strides = [1, 1]} : vector<2x256xf32> to vector<1x256xf32>
    %11 = vector.broadcast %9 : vector<10x1xf32> to vector<10x256xf32>
    %12 = vector.broadcast %10 : vector<1x256xf32> to vector<10x256xf32>
    %13 = arith.mulf %11, %12 : vector<10x256xf32>
    %14 = arith.addf %8, %13 : vector<10x256xf32>
    %c0_7 = arith.constant 0 : index
    %c0_8 = arith.constant 0 : index
    %15 = vector.load %arg3[%c0_7, %c0_8] : memref<10x1xf32, #tpu.memory_space<vmem>>, vector<10x1xf32>
    %16 = vector.broadcast %15 : vector<10x1xf32> to vector<10x256xf32>
    %17 = arith.addf %14, %16 : vector<10x256xf32>
    %cst = arith.constant 0.000000e+00 : f32
    %18 = vector.broadcast %cst : f32 to vector<10x256xf32>
    %19 = arith.maximumf %17, %18 : vector<10x256xf32>
    %c0_9 = arith.constant 0 : index
    %c0_10 = arith.constant 0 : index
    %20 = vector.load %arg5[%c0_9, %c0_10] : memref<10x1xf32, #tpu.memory_space<vmem>>, vector<10x1xf32>
    %21 = vector.shape_cast %20 : vector<10x1xf32> to vector<10x1xf32>
    %22 = vector.broadcast %21 : vector<10x1xf32> to vector<10x256xf32>
    %23 = vector.extract_strided_slice %2 {offsets = [0, 0], sizes = [10, 1], strides = [1, 1]} : vector<10x10xf32> to vector<10x1xf32>
    %24 = vector.extract_strided_slice %19 {offsets = [0, 0], sizes = [1, 256], strides = [1, 1]} : vector<10x256xf32> to vector<1x256xf32>
    %25 = vector.broadcast %23 : vector<10x1xf32> to vector<10x256xf32>
    %26 = vector.broadcast %24 : vector<1x256xf32> to vector<10x256xf32>
    %27 = arith.mulf %25, %26 : vector<10x256xf32>
    %28 = arith.addf %22, %27 : vector<10x256xf32>
    %29 = vector.extract_strided_slice %2 {offsets = [0, 1], sizes = [10, 1], strides = [1, 1]} : vector<10x10xf32> to vector<10x1xf32>
    %30 = vector.extract_strided_slice %19 {offsets = [1, 0], sizes = [1, 256], strides = [1, 1]} : vector<10x256xf32> to vector<1x256xf32>
    %31 = vector.broadcast %29 : vector<10x1xf32> to vector<10x256xf32>
    %32 = vector.broadcast %30 : vector<1x256xf32> to vector<10x256xf32>
    %33 = arith.mulf %31, %32 : vector<10x256xf32>
    %34 = arith.addf %28, %33 : vector<10x256xf32>
    %35 = vector.extract_strided_slice %2 {offsets = [0, 2], sizes = [10, 1], strides = [1, 1]} : vector<10x10xf32> to vector<10x1xf32>
    %36 = vector.extract_strided_slice %19 {offsets = [2, 0], sizes = [1, 256], strides = [1, 1]} : vector<10x256xf32> to vector<1x256xf32>
    %37 = vector.broadcast %35 : vector<10x1xf32> to vector<10x256xf32>
    %38 = vector.broadcast %36 : vector<1x256xf32> to vector<10x256xf32>
    %39 = arith.mulf %37, %38 : vector<10x256xf32>
    %40 = arith.addf %34, %39 : vector<10x256xf32>
    %41 = vector.extract_strided_slice %2 {offsets = [0, 3], sizes = [10, 1], strides = [1, 1]} : vector<10x10xf32> to vector<10x1xf32>
    %42 = vector.extract_strided_slice %19 {offsets = [3, 0], sizes = [1, 256], strides = [1, 1]} : vector<10x256xf32> to vector<1x256xf32>
    %43 = vector.broadcast %41 : vector<10x1xf32> to vector<10x256xf32>
    %44 = vector.broadcast %42 : vector<1x256xf32> to vector<10x256xf32>
    %45 = arith.mulf %43, %44 : vector<10x256xf32>
    %46 = arith.addf %40, %45 : vector<10x256xf32>
    %47 = vector.extract_strided_slice %2 {offsets = [0, 4], sizes = [10, 1], strides = [1, 1]} : vector<10x10xf32> to vector<10x1xf32>
    %48 = vector.extract_strided_slice %19 {offsets = [4, 0], sizes = [1, 256], strides = [1, 1]} : vector<10x256xf32> to vector<1x256xf32>
    %49 = vector.broadcast %47 : vector<10x1xf32> to vector<10x256xf32>
    %50 = vector.broadcast %48 : vector<1x256xf32> to vector<10x256xf32>
    %51 = arith.mulf %49, %50 : vector<10x256xf32>
    %52 = arith.addf %46, %51 : vector<10x256xf32>
    %53 = vector.extract_strided_slice %2 {offsets = [0, 5], sizes = [10, 1], strides = [1, 1]} : vector<10x10xf32> to vector<10x1xf32>
    %54 = vector.extract_strided_slice %19 {offsets = [5, 0], sizes = [1, 256], strides = [1, 1]} : vector<10x256xf32> to vector<1x256xf32>
    %55 = vector.broadcast %53 : vector<10x1xf32> to vector<10x256xf32>
    %56 = vector.broadcast %54 : vector<1x256xf32> to vector<10x256xf32>
    %57 = arith.mulf %55, %56 : vector<10x256xf32>
    %58 = arith.addf %52, %57 : vector<10x256xf32>
    %59 = vector.extract_strided_slice %2 {offsets = [0, 6], sizes = [10, 1], strides = [1, 1]} : vector<10x10xf32> to vector<10x1xf32>
    %60 = vector.extract_strided_slice %19 {offsets = [6, 0], sizes = [1, 256], strides = [1, 1]} : vector<10x256xf32> to vector<1x256xf32>
    %61 = vector.broadcast %59 : vector<10x1xf32> to vector<10x256xf32>
    %62 = vector.broadcast %60 : vector<1x256xf32> to vector<10x256xf32>
    %63 = arith.mulf %61, %62 : vector<10x256xf32>
    %64 = arith.addf %58, %63 : vector<10x256xf32>
    %65 = vector.extract_strided_slice %2 {offsets = [0, 7], sizes = [10, 1], strides = [1, 1]} : vector<10x10xf32> to vector<10x1xf32>
    %66 = vector.extract_strided_slice %19 {offsets = [7, 0], sizes = [1, 256], strides = [1, 1]} : vector<10x256xf32> to vector<1x256xf32>
    %67 = vector.broadcast %65 : vector<10x1xf32> to vector<10x256xf32>
    %68 = vector.broadcast %66 : vector<1x256xf32> to vector<10x256xf32>
    %69 = arith.mulf %67, %68 : vector<10x256xf32>
    %70 = arith.addf %64, %69 : vector<10x256xf32>
    %71 = vector.extract_strided_slice %2 {offsets = [0, 8], sizes = [10, 1], strides = [1, 1]} : vector<10x10xf32> to vector<10x1xf32>
    %72 = vector.extract_strided_slice %19 {offsets = [8, 0], sizes = [1, 256], strides = [1, 1]} : vector<10x256xf32> to vector<1x256xf32>
    %73 = vector.broadcast %71 : vector<10x1xf32> to vector<10x256xf32>
    %74 = vector.broadcast %72 : vector<1x256xf32> to vector<10x256xf32>
    %75 = arith.mulf %73, %74 : vector<10x256xf32>
    %76 = arith.addf %70, %75 : vector<10x256xf32>
    %77 = vector.extract_strided_slice %2 {offsets = [0, 9], sizes = [10, 1], strides = [1, 1]} : vector<10x10xf32> to vector<10x1xf32>
    %78 = vector.extract_strided_slice %19 {offsets = [9, 0], sizes = [1, 256], strides = [1, 1]} : vector<10x256xf32> to vector<1x256xf32>
    %79 = vector.broadcast %77 : vector<10x1xf32> to vector<10x256xf32>
    %80 = vector.broadcast %78 : vector<1x256xf32> to vector<10x256xf32>
    %81 = arith.mulf %79, %80 : vector<10x256xf32>
    %82 = arith.addf %76, %81 : vector<10x256xf32>
    %cst_11 = arith.constant 0.000000e+00 : f32
    %83 = vector.broadcast %cst_11 : f32 to vector<10x256xf32>
    %84 = arith.maximumf %82, %83 : vector<10x256xf32>
    %c0_12 = arith.constant 0 : index
    %c0_13 = arith.constant 0 : index
    %85 = vector.load %arg7[%c0_12, %c0_13] : memref<1x1xf32, #tpu.memory_space<vmem>>, vector<1x1xf32>
    %86 = vector.shape_cast %85 : vector<1x1xf32> to vector<1x1xf32>
    %87 = vector.broadcast %86 : vector<1x1xf32> to vector<1x256xf32>
    %88 = vector.extract_strided_slice %3 {offsets = [0, 0], sizes = [1, 1], strides = [1, 1]} : vector<1x10xf32> to vector<1x1xf32>
    %89 = vector.extract_strided_slice %84 {offsets = [0, 0], sizes = [1, 256], strides = [1, 1]} : vector<10x256xf32> to vector<1x256xf32>
    %90 = vector.broadcast %88 : vector<1x1xf32> to vector<1x256xf32>
    %91 = arith.mulf %90, %89 : vector<1x256xf32>
    %92 = arith.addf %87, %91 : vector<1x256xf32>
    %93 = vector.extract_strided_slice %3 {offsets = [0, 1], sizes = [1, 1], strides = [1, 1]} : vector<1x10xf32> to vector<1x1xf32>
    %94 = vector.extract_strided_slice %84 {offsets = [1, 0], sizes = [1, 256], strides = [1, 1]} : vector<10x256xf32> to vector<1x256xf32>
    %95 = vector.broadcast %93 : vector<1x1xf32> to vector<1x256xf32>
    %96 = arith.mulf %95, %94 : vector<1x256xf32>
    %97 = arith.addf %92, %96 : vector<1x256xf32>
    %98 = vector.extract_strided_slice %3 {offsets = [0, 2], sizes = [1, 1], strides = [1, 1]} : vector<1x10xf32> to vector<1x1xf32>
    %99 = vector.extract_strided_slice %84 {offsets = [2, 0], sizes = [1, 256], strides = [1, 1]} : vector<10x256xf32> to vector<1x256xf32>
    %100 = vector.broadcast %98 : vector<1x1xf32> to vector<1x256xf32>
    %101 = arith.mulf %100, %99 : vector<1x256xf32>
    %102 = arith.addf %97, %101 : vector<1x256xf32>
    %103 = vector.extract_strided_slice %3 {offsets = [0, 3], sizes = [1, 1], strides = [1, 1]} : vector<1x10xf32> to vector<1x1xf32>
    %104 = vector.extract_strided_slice %84 {offsets = [3, 0], sizes = [1, 256], strides = [1, 1]} : vector<10x256xf32> to vector<1x256xf32>
    %105 = vector.broadcast %103 : vector<1x1xf32> to vector<1x256xf32>
    %106 = arith.mulf %105, %104 : vector<1x256xf32>
    %107 = arith.addf %102, %106 : vector<1x256xf32>
    %108 = vector.extract_strided_slice %3 {offsets = [0, 4], sizes = [1, 1], strides = [1, 1]} : vector<1x10xf32> to vector<1x1xf32>
    %109 = vector.extract_strided_slice %84 {offsets = [4, 0], sizes = [1, 256], strides = [1, 1]} : vector<10x256xf32> to vector<1x256xf32>
    %110 = vector.broadcast %108 : vector<1x1xf32> to vector<1x256xf32>
    %111 = arith.mulf %110, %109 : vector<1x256xf32>
    %112 = arith.addf %107, %111 : vector<1x256xf32>
    %113 = vector.extract_strided_slice %3 {offsets = [0, 5], sizes = [1, 1], strides = [1, 1]} : vector<1x10xf32> to vector<1x1xf32>
    %114 = vector.extract_strided_slice %84 {offsets = [5, 0], sizes = [1, 256], strides = [1, 1]} : vector<10x256xf32> to vector<1x256xf32>
    %115 = vector.broadcast %113 : vector<1x1xf32> to vector<1x256xf32>
    %116 = arith.mulf %115, %114 : vector<1x256xf32>
    %117 = arith.addf %112, %116 : vector<1x256xf32>
    %118 = vector.extract_strided_slice %3 {offsets = [0, 6], sizes = [1, 1], strides = [1, 1]} : vector<1x10xf32> to vector<1x1xf32>
    %119 = vector.extract_strided_slice %84 {offsets = [6, 0], sizes = [1, 256], strides = [1, 1]} : vector<10x256xf32> to vector<1x256xf32>
    %120 = vector.broadcast %118 : vector<1x1xf32> to vector<1x256xf32>
    %121 = arith.mulf %120, %119 : vector<1x256xf32>
    %122 = arith.addf %117, %121 : vector<1x256xf32>
    %123 = vector.extract_strided_slice %3 {offsets = [0, 7], sizes = [1, 1], strides = [1, 1]} : vector<1x10xf32> to vector<1x1xf32>
    %124 = vector.extract_strided_slice %84 {offsets = [7, 0], sizes = [1, 256], strides = [1, 1]} : vector<10x256xf32> to vector<1x256xf32>
    %125 = vector.broadcast %123 : vector<1x1xf32> to vector<1x256xf32>
    %126 = arith.mulf %125, %124 : vector<1x256xf32>
    %127 = arith.addf %122, %126 : vector<1x256xf32>
    %128 = vector.extract_strided_slice %3 {offsets = [0, 8], sizes = [1, 1], strides = [1, 1]} : vector<1x10xf32> to vector<1x1xf32>
    %129 = vector.extract_strided_slice %84 {offsets = [8, 0], sizes = [1, 256], strides = [1, 1]} : vector<10x256xf32> to vector<1x256xf32>
    %130 = vector.broadcast %128 : vector<1x1xf32> to vector<1x256xf32>
    %131 = arith.mulf %130, %129 : vector<1x256xf32>
    %132 = arith.addf %127, %131 : vector<1x256xf32>
    %133 = vector.extract_strided_slice %3 {offsets = [0, 9], sizes = [1, 1], strides = [1, 1]} : vector<1x10xf32> to vector<1x1xf32>
    %134 = vector.extract_strided_slice %84 {offsets = [9, 0], sizes = [1, 256], strides = [1, 1]} : vector<10x256xf32> to vector<1x256xf32>
    %135 = vector.broadcast %133 : vector<1x1xf32> to vector<1x256xf32>
    %136 = arith.mulf %135, %134 : vector<1x256xf32>
    %137 = arith.addf %132, %136 : vector<1x256xf32>
    %c0_14 = arith.constant 0 : index
    %c0_15 = arith.constant 0 : index
    %138 = vector.load %arg8[%c0_14, %c0_15] : memref<1x256xf32, #tpu.memory_space<vmem>>, vector<1x256xf32>
    tpu.vector_store %arg8[%c0_14, %c0_15], %137 {strides = array<i32>} : memref<1x256xf32, #tpu.memory_space<vmem>>, vector<1x256xf32>,
    return
  }
  func.func @transform_0(%arg0: i32) -> (i32, i32) {
    %c0_i32 = arith.constant 0 : i32
    %c0_i32_0 = arith.constant 0 : i32
    return %c0_i32, %arg0 : i32, i32
  }
  func.func @transform_1(%arg0: i32) -> (i32, i32) {
    %c0_i32 = arith.constant 0 : i32
    %c0_i32_0 = arith.constant 0 : i32
    %c0_i32_1 = arith.constant 0 : i32
    return %c0_i32, %c0_i32_0 : i32, i32
  }
  func.func @transform_2(%arg0: i32) -> (i32, i32) {
    %c0_i32 = arith.constant 0 : i32
    %c0_i32_0 = arith.constant 0 : i32
    %c0_i32_1 = arith.constant 0 : i32
    return %c0_i32, %c0_i32_0 : i32, i32
  }
  func.func @transform_3(%arg0: i32) -> (i32, i32) {
    %c0_i32 = arith.constant 0 : i32
    %c0_i32_0 = arith.constant 0 : i32
    %c0_i32_1 = arith.constant 0 : i32
    return %c0_i32, %c0_i32_0 : i32, i32
  }
  func.func @transform_4(%arg0: i32) -> (i32, i32) {
    %c0_i32 = arith.constant 0 : i32
    %c0_i32_0 = arith.constant 0 : i32
    %c0_i32_1 = arith.constant 0 : i32
    return %c0_i32, %c0_i32_0 : i32, i32
  }
  func.func @transform_5(%arg0: i32) -> (i32, i32) {
    %c0_i32 = arith.constant 0 : i32
    %c0_i32_0 = arith.constant 0 : i32
    %c0_i32_1 = arith.constant 0 : i32
    return %c0_i32, %c0_i32_0 : i32, i32
  }
  func.func @transform_6(%arg0: i32) -> (i32, i32) {
    %c0_i32 = arith.constant 0 : i32
    %c0_i32_0 = arith.constant 0 : i32
    %c0_i32_1 = arith.constant 0 : i32
    return %c0_i32, %c0_i32_0 : i32, i32
  }
  func.func @transform_7(%arg0: i32) -> (i32, i32) {
    %c0_i32 = arith.constant 0 : i32
    %c0_i32_0 = arith.constant 0 : i32
    return %c0_i32, %arg0 : i32, i32
  }
}

</mosaic_0001>

<bundles_post_ra>
// kernel: tpu_custom_call.1
= control target key start
LH: loop header
LB: loop body
LE: loop exit
PB: predicated region body
PF: predicated region fallthrough
CT: control target
= control target key end

     0   :  { %s690_s0 = inlined_call_operand.vmem [shape: f32[2,256], index: 0, kind: input, shape index: {}]   ;;  %s691_s1 = inlined_call_operand.vmem [shape: f32[10,2], index: 1, kind: input, shape index: {}]   ;;  %s692_s2 = inlined_call_operand.vmem [shape: f32[10,1], index: 2, kind: input, shape index: {}]   ;;  %s693_s3 = inlined_call_operand.vmem [shape: f32[10,10], index: 3, kind: input, shape index: {}]   ;;  %s694_s4 = inlined_call_operand.vmem [shape: f32[10,1], index: 4, kind: input, shape index: {}]   ;;  %s695_s5 = inlined_call_operand.vmem [shape: f32[1,10], index: 5, kind: input, shape index: {}]   ;;  %s696_s6 = inlined_call_operand.<no memory space> [shape: f32[1,1], index: 6, kind: input, shape index: {}]   ;;  %s697_s7 = inlined_call_operand.hbm [shape: f32[1,256], index: 7, kind: output, shape index: {}]  }
   0x1   :  { %v12_v0 = vstv %s696_s6 }
   0x2   :  { %13 = vst [vmem:[#allocation2] sm:$0x1] %v12_v0 }
   0x3   :  { %v78_v1 = vld [vmem:[%s692_s2] sm:$0xff]  ;;  %v539_v3 = vmov 1   ;;  %v540_v4 = vmov 0  }
   0x4   :  { %v30_v2 = vld [vmem:[%s691_s1] sm:$0xff]  ;;  %481 = vset.pattern.permute.xlu1 %v539_v3  ;;  %482 = vset.pattern.permute.xlu2 %v540_v4 }
   0x5   :  { %480 = vset.pattern.permute.xlu0 %v540_v4  ;;  %82 = vperm.xlu2 %482, %v78_v1  }
   0x6   :  { %14 = vsyncpa [#allocation4], 0  ;;  %57 = vperm.xlu1 %481, %v30_v2   ;;  %37 = vperm.xlu0 %480, %v30_v2   ;;  %v79_v5 = vld [vmem:[%s692_s2 + $0x8] sm:$0x3]  ;;  %v32_v7 = vld [vmem:[%s693_s3] sm:$0xff]  ;;  %v541_v11 = vmov 2  }
   0x7   :  { %v31_v6 = vld [vmem:[%s691_s1 + $0x8] sm:$0x3]  ;;  %v98_v8 = vld [vmem:[%s694_s4] sm:$0xff]  ;;  %v542_v12 = vmov 3   ;;  %v543_v13 = vmov 4   ;;  %v544_v14 = vmov 7  }
   0x8   :  { %v99_v9 = vld [vmem:[%s694_s4 + $0x8] sm:$0x3]  ;;  %v545_v15 = vmov 5   ;;  %v546_v16 = vmov 9   ;;  %v547_v17 = vmov 6   ;;  %v548_v19 = vmov 8  }
   0x9   :  { %v33_v10 = vld [vmem:[%s693_s3 + $0x8] sm:$0x3]  ;;  %v627_v18 = vld [vmem:[%s695_s5] sm:$0x1]  ;;  %s460_s20 = sshll.u32 %s697_s7, 4  ;;  %vm445_vm0 = vcmask 1040384   ;;  %s461_s20 = int_to_ptr.hbm [resolvable:$true] %s460_s20 }
   0xa   :  { %v296_v21 = vld [vmem:[#allocation2] sm:$0x1] }
   0xb   :  { %v29_v23 = vld [vmem:[%s690_s0] sm:$0xf]  ;;  %s549_s0 = smov [#allocation3]  }
   0xc   :  { %v64_v24 = vperm.slane %v29_v23, 1  ;;  %v65_v25 = vperm.slane %v29_v23, 3  ;;  %v46_v26 = vperm.slane %v29_v23, 0  ;;  %v47_v27 = vperm.slane %v29_v23, 2  ;;  %s458_s17 = sshll.u32 %s549_s0, 4  ;;  %s459_s17 = int_to_ptr.vmem [resolvable:$true] %s458_s17 }
   0xd   :  { %87 = vperm.xlu2 %482, %v79_v5  }
   0xe   :  { %61 = vperm.xlu1 %481, %v31_v6   ;;  %42 = vperm.xlu0 %480, %v31_v6   ;;  %v68_v29 = vperm.slane %v64_v24, 1  ;;  %v69_v30 = vperm.slane %v65_v25, 1  ;;  %v50_v31 = vperm.slane %v46_v26, 0  ;;  %v51_v32 = vperm.slane %v47_v27, 0 }
  0x15   :  { %112 = vperm.xlu2 %482, %v32_v7  }
  0x16   :  { %483 = vset.pattern.permute.xlu1 %v540_v4  ;;  %102 = vperm.xlu0 %480, %v98_v8  }
  0x17   :  { %107 = vperm.xlu1 %483, %v99_v9  }
  0x1d   :  { %485 = vset.pattern.permute.xlu2 %v539_v3 }
  0x1e   :  { %117 = vperm.xlu0 %480, %v33_v10   ;;  %135 = vperm.xlu2 %485, %v33_v10  }
  0x1f   :  { %484 = vset.pattern.permute.xlu1 %v539_v3 }
  0x20   :  { %131 = vperm.xlu1 %484, %v32_v7  }
  0x26   :  { %486 = vset.pattern.permute.xlu0 %v541_v11  ;;  %488 = vset.pattern.permute.xlu2 %v542_v12 }
  0x27   :  { %149 = vperm.xlu0 %486, %v32_v7   ;;  %167 = vperm.xlu2 %488, %v32_v7  }
  0x28   :  { %487 = vset.pattern.permute.xlu1 %v541_v11 }
  0x29   :  { %153 = vperm.xlu1 %487, %v33_v10  }
  0x2f   :  { %491 = vset.pattern.permute.xlu0 %v543_v13  ;;  %490 = vset.pattern.permute.xlu2 %v543_v13 }
  0x30   :  { %189 = vperm.xlu0 %491, %v33_v10   ;;  %185 = vperm.xlu2 %490, %v32_v7  }
  0x31   :  { %489 = vset.pattern.permute.xlu1 %v542_v12 }
  0x32   :  { %171 = vperm.xlu1 %489, %v33_v10  }
  0x38   :  { %496 = vset.pattern.permute.xlu0 %v544_v14  ;;  %493 = vset.pattern.permute.xlu2 %v545_v15 }
  0x39   :  { %239 = vperm.xlu0 %496, %v32_v7   ;;  %207 = vperm.xlu2 %493, %v33_v10  }
  0x3a   :  { %492 = vset.pattern.permute.xlu1 %v545_v15 }
  0x3b   :  { %203 = vperm.xlu1 %492, %v32_v7  }
  0x41   :  { %501 = vset.pattern.permute.xlu0 %v546_v16  ;;  %495 = vset.pattern.permute.xlu2 %v547_v17 }
  0x42   :  { %279 = vperm.xlu0 %501, %v33_v10   ;;  %225 = vperm.xlu2 %495, %v33_v10  }
  0x43   :  { %494 = vset.pattern.permute.xlu1 %v547_v17 }
  0x44   :  { %221 = vperm.xlu1 %494, %v32_v7  }
  0x4a   :  { %498 = vset.pattern.permute.xlu2 %v548_v19  ;;  %505 = vset.pattern.permute.xlu0 %v542_v12 }
  0x4b   :  { %257 = vperm.xlu2 %498, %v32_v7   ;;  %344 = vperm.xlu0 %505, %v627_v18  }
  0x4c   :  { %497 = vset.pattern.permute.xlu1 %v544_v14 }
  0x4d   :  { %243 = vperm.xlu1 %497, %v33_v10  }
  0x53   :  { %500 = vset.pattern.permute.xlu2 %v546_v16  ;;  %510 = vset.pattern.permute.xlu0 %v548_v19 }
  0x54   :  { %275 = vperm.xlu2 %500, %v32_v7   ;;  %419 = vperm.xlu0 %510, %v627_v18  }
  0x55   :  { %499 = vset.pattern.permute.xlu1 %v548_v19 }
  0x56   :  { %261 = vperm.xlu1 %499, %v33_v10  }
  0x5c   :  { %503 = vset.pattern.permute.xlu2 %v539_v3  ;;  %512 = vset.pattern.permute.xlu0 %v546_v16 }
  0x5d   :  { %314 = vperm.xlu2 %503, %v627_v18  }
  0x5e   :  { %502 = vset.pattern.permute.xlu1 %v540_v4 }
  0x5f   :  { %305 = vperm.xlu1 %502, %v627_v18   ;;  %v83_v20 = vpop.permute.xlu2 %82 }
  0x65   :  { %504 = vset.pattern.permute.xlu2 %v541_v11 }
  0x66   :  { %329 = vperm.xlu2 %504, %v627_v18  }
  0x67   :  { %299 = vperm.xlu1 %502, %v296_v21   ;;  %v88_v22 = vpop.permute.xlu2 %87 }
  0x6e   :  { %507 = vset.pattern.permute.xlu2 %v545_v15 }
  0x6f   :  { %506 = vset.pattern.permute.xlu1 %v543_v13  ;;  %374 = vperm.xlu2 %507, %v627_v18   ;;  %v643_v28 = vpop.permute.xlu2 %112 }
  0x70   :  { %359 = vperm.xlu1 %506, %v627_v18  }
  0x77   :  { %509 = vset.pattern.permute.xlu2 %v544_v14 }
  0x78   :  { %508 = vset.pattern.permute.xlu1 %v547_v17  ;;  %v58_v33 = vpop.permute.xlu1 %57  ;;  %v38_v34 = vpop.permute.xlu0 %37  ;;  %404 = vperm.xlu2 %509, %v627_v18  }
  0x79   :  { %v70_v35 = vmul.f32 %v68_v29, %v58_v33  ;;  %v71_v36 = vmul.f32 %v69_v30, %v58_v33  ;;  %v52_v37 = vmul.f32 %v50_v31, %v38_v34  ;;  %v53_v38 = vmul.f32 %v51_v32, %v38_v34  ;;  %389 = vperm.xlu1 %508, %v627_v18   ;;  %v136_v43 = vpop.permute.xlu2 %135 }
  0x7b   :  { %v74_v39 = vadd.f32 %v70_v35, %v52_v37  ;;  %v75_v40 = vadd.f32 %v71_v36, %v53_v38 }
  0x7d   :  { %v90_v41 = vadd.f32 %v83_v20, %v74_v39  ;;  %v91_v42 = vadd.f32 %v83_v20, %v75_v40 }
  0x7f   :  { %v647_v44 = vmax.f32 %v90_v41, 0.0  ;;  %v649_v45 = vmax.f32 %v91_v42, 0.0 }
  0x80   :  { %v62_v46 = vpop.permute.xlu1 %61  ;;  %v43_v47 = vpop.permute.xlu0 %42 }
  0x81   :  { %v138_v48 = vperm.slane %v647_v44, 1  ;;  %v139_v49 = vperm.slane %v649_v45, 1  ;;  %v72_v50 = vmul.f32 %v68_v29, %v62_v46  ;;  %v73_v51 = vmul.f32 %v69_v30, %v62_v46  ;;  %511 = vset.pattern.permute.xlu1 %v546_v16  ;;  %v659_v60 = vpop.permute.xlu2 %167 }
  0x82   :  { %v54_v52 = vmul.f32 %v50_v31, %v43_v47  ;;  %v55_v53 = vmul.f32 %v51_v32, %v43_v47  ;;  %428 = vperm.xlu1 %511, %v627_v18   ;;  %v120_v63 = vperm.slane %v647_v44, 0  ;;  %v121_v0 = vperm.slane %v649_v45, 0 }
  0x83   :  { %v142_v54 = vmul.f32 %v138_v48, %v136_v43  ;;  %v143_v55 = vmul.f32 %v139_v49, %v136_v43  ;;  %v156_v11 = vperm.slane %v647_v44, 2  ;;  %v157_v12 = vperm.slane %v649_v45, 2 }
  0x84   :  { %v76_v56 = vadd.f32 %v72_v50, %v54_v52  ;;  %v77_v57 = vadd.f32 %v73_v51, %v55_v53  ;;  %v174_v19 = vperm.slane %v647_v44, 3  ;;  %v175_v20 = vperm.slane %v649_v45, 3 }
  0x85   :  { %v122_v21 = vmul.f32 %v120_v63, %v643_v28  ;;  %v192_v23 = vperm.slane %v647_v44, 4  ;;  %v193_v24 = vperm.slane %v649_v45, 4  ;;  %v210_v27 = vperm.slane %v647_v44, 5 }
  0x86   :  { %v655_v58 = vadd.f32 %v88_v22, %v76_v56  ;;  %v657_v59 = vadd.f32 %v88_v22, %v77_v57  ;;  %v123_v22 = vmul.f32 %v121_v0, %v643_v28  ;;  %v211_v29 = vperm.slane %v649_v45, 5 }
  0x87   :  { %v228_v35 = vperm.slane %v647_v44, 6  ;;  %v229_v36 = vperm.slane %v649_v45, 6 }
  0x88   :  { %v103_v61 = vpop.permute.xlu0 %102 }
  0x89   :  { %v108_v62 = vpop.permute.xlu1 %107  ;;  %v126_v40 = vadd.f32 %v122_v21, %v103_v61  ;;  %v127_v41 = vadd.f32 %v123_v22, %v103_v61  ;;  %v177_v61 = vmul.f32 %v175_v20, %v659_v60 }
  0x8a   :  { %v186_v4 = vpop.permute.xlu2 %185 }
  0x90   :  { %v118_v1 = vpop.permute.xlu0 %117 }
  0x91   :  { %v124_v2 = vmul.f32 %v120_v63, %v118_v1  ;;  %v125_v3 = vmul.f32 %v121_v0, %v118_v1  ;;  %v176_v1 = vmul.f32 %v174_v19, %v659_v60 }
  0x92   :  { %v132_v5 = vpop.permute.xlu1 %131 }
  0x93   :  { %v128_v6 = vadd.f32 %v124_v2, %v108_v62  ;;  %v129_v7 = vadd.f32 %v125_v3, %v108_v62  ;;  %v208_v14 = vpop.permute.xlu2 %207  ;;  %v140_v32 = vmul.f32 %v138_v48, %v132_v5  ;;  %v141_v33 = vmul.f32 %v139_v49, %v132_v5 }
  0x94   :  { %v214_v42 = vmul.f32 %v210_v27, %v208_v14  ;;  %v215_v43 = vmul.f32 %v211_v29, %v208_v14 }
  0x95   :  { %v146_v8 = vadd.f32 %v142_v54, %v128_v6  ;;  %v147_v9 = vadd.f32 %v143_v55, %v129_v7  ;;  %v144_v52 = vadd.f32 %v140_v32, %v126_v40  ;;  %v145_v48 = vadd.f32 %v141_v33, %v127_v41 }
  0x96   :  { %v194_v6 = vmul.f32 %v192_v23, %v186_v4  ;;  %v195_v7 = vmul.f32 %v193_v24, %v186_v4 }
  0x99   :  { %v150_v10 = vpop.permute.xlu0 %149 }
  0x9a   :  { %v158_v46 = vmul.f32 %v156_v11, %v150_v10  ;;  %v159_v47 = vmul.f32 %v157_v12, %v150_v10  ;;  %v96_v10 = vmax.f32 %v655_v58, 0.0 }
  0x9b   :  { %v154_v13 = vpop.permute.xlu1 %153 }
  0x9c   :  { %v160_v15 = vmul.f32 %v156_v11, %v154_v13  ;;  %v161_v16 = vmul.f32 %v157_v12, %v154_v13  ;;  %v226_v34 = vpop.permute.xlu2 %225  ;;  %v162_v56 = vadd.f32 %v158_v46, %v144_v52  ;;  %v163_v57 = vadd.f32 %v159_v47, %v145_v48 }
  0x9d   :  { %v232_v49 = vmul.f32 %v228_v35, %v226_v34  ;;  %v233_v53 = vmul.f32 %v229_v36, %v226_v34  ;;  %v97_v11 = vmax.f32 %v657_v59, 0.0  ;;  %v264_v21 = vperm.slane %v96_v10, 0 }
  0x9e   :  { %v164_v17 = vadd.f32 %v160_v15, %v146_v8  ;;  %v165_v18 = vadd.f32 %v161_v16, %v147_v9  ;;  %v180_v3 = vadd.f32 %v176_v1, %v162_v56  ;;  %v181_v5 = vadd.f32 %v177_v61, %v163_v57 }
  0x9f   :  { %v246_v15 = vperm.slane %v647_v44, 7  ;;  %v247_v16 = vperm.slane %v649_v45, 7  ;;  %v265_v4 = vperm.slane %v97_v11, 0  ;;  %v282_v59 = vperm.slane %v96_v10, 1 }
  0xa0   :  { %v198_v12 = vadd.f32 %v194_v6, %v180_v3  ;;  %v199_v13 = vadd.f32 %v195_v7, %v181_v5 }
  0xa2   :  { %v190_v25 = vpop.permute.xlu0 %189 }
  0xa3   :  { %v196_v28 = vmul.f32 %v192_v23, %v190_v25  ;;  %v197_v37 = vmul.f32 %v193_v24, %v190_v25 }
  0xa4   :  { %v172_v26 = vpop.permute.xlu1 %171 }
  0xa5   :  { %v178_v30 = vmul.f32 %v174_v19, %v172_v26  ;;  %v179_v31 = vmul.f32 %v175_v20, %v172_v26  ;;  %v258_v2 = vpop.permute.xlu2 %257  ;;  %v283_v26 = vperm.slane %v97_v11, 1 }
  0xa7   :  { %v182_v38 = vadd.f32 %v178_v30, %v164_v17  ;;  %v183_v39 = vadd.f32 %v179_v31, %v165_v18 }
  0xa9   :  { %v200_v50 = vadd.f32 %v196_v28, %v182_v38  ;;  %v201_v51 = vadd.f32 %v197_v37, %v183_v39 }
  0xab   :  { %v218_v54 = vadd.f32 %v214_v42, %v200_v50  ;;  %v219_v55 = vadd.f32 %v215_v43, %v201_v51  ;;  %v240_v14 = vpop.permute.xlu0 %239 }
  0xac   :  { %v248_v22 = vmul.f32 %v246_v15, %v240_v14  ;;  %v249_v23 = vmul.f32 %v247_v16, %v240_v14 }
  0xad   :  { %v204_v62 = vpop.permute.xlu1 %203  ;;  %v236_v63 = vadd.f32 %v232_v49, %v218_v54  ;;  %v237_v0 = vadd.f32 %v233_v53, %v219_v55 }
  0xae   :  { %v212_v8 = vmul.f32 %v210_v27, %v204_v62  ;;  %v213_v9 = vmul.f32 %v211_v29, %v204_v62  ;;  %v276_v25 = vpop.permute.xlu2 %275  ;;  %v266_v27 = vmul.f32 %v264_v21, %v258_v2  ;;  %v267_v29 = vmul.f32 %v265_v4, %v258_v2 }
  0xaf   :  { %v284_v31 = vmul.f32 %v282_v59, %v276_v25  ;;  %v285_v45 = vmul.f32 %v283_v26, %v276_v25 }
  0xb0   :  { %v216_v60 = vadd.f32 %v212_v8, %v198_v12  ;;  %v217_v18 = vadd.f32 %v213_v9, %v199_v13 }
  0xb4   :  { %v280_v40 = vpop.permute.xlu0 %279 }
  0xb5   :  { %v286_v47 = vmul.f32 %v282_v59, %v280_v40  ;;  %v287_v50 = vmul.f32 %v283_v26, %v280_v40 }
  0xb6   :  { %v222_v17 = vpop.permute.xlu1 %221 }
  0xb7   :  { %v230_v19 = vmul.f32 %v228_v35, %v222_v17  ;;  %v231_v20 = vmul.f32 %v229_v36, %v222_v17  ;;  %v315_v42 = vpop.permute.xlu2 %314 }
  0xb8   :  { %v317_v57 = vperm.slane %v315_v42, 0 }
  0xb9   :  { %v234_v24 = vadd.f32 %v230_v19, %v216_v60  ;;  %v235_v58 = vadd.f32 %v231_v20, %v217_v18 }
  0xbb   :  { %v252_v30 = vadd.f32 %v248_v22, %v234_v24  ;;  %v253_v44 = vadd.f32 %v249_v23, %v235_v58 }
  0xbd   :  { %v270_v32 = vadd.f32 %v266_v27, %v252_v30  ;;  %v271_v33 = vadd.f32 %v267_v29, %v253_v44  ;;  %v345_v3 = vpop.permute.xlu0 %344 }
  0xbe   :  { %v347_v10 = vperm.slane %v345_v3, 0 }
  0xbf   :  { %v288_v34 = vadd.f32 %v284_v31, %v270_v32  ;;  %v289_v35 = vadd.f32 %v285_v45, %v271_v33  ;;  %v244_v36 = vpop.permute.xlu1 %243 }
  0xc0   :  { %v250_v28 = vmul.f32 %v246_v15, %v244_v36  ;;  %v251_v37 = vmul.f32 %v247_v16, %v244_v36  ;;  %v330_v54 = vpop.permute.xlu2 %329 }
  0xc1   :  { %v292_v55 = vmax.f32 %v288_v34, 0.0  ;;  %v293_v56 = vmax.f32 %v289_v35, 0.0  ;;  %v332_v1 = vperm.slane %v330_v54, 0 }
  0xc2   :  { %v254_v38 = vadd.f32 %v250_v28, %v236_v63  ;;  %v255_v39 = vadd.f32 %v251_v37, %v237_v0 }
  0xc3   :  { %v318_v61 = vmul.f32 %v317_v57, %v292_v55  ;;  %v319_v2 = vmul.f32 %v317_v57, %v293_v56  ;;  %v333_v13 = vmul.f32 %v332_v1, %v292_v55  ;;  %v334_v14 = vmul.f32 %v332_v1, %v293_v56 }
  0xc4   :  { %v348_v18 = vmul.f32 %v347_v10, %v292_v55  ;;  %v349_v19 = vmul.f32 %v347_v10, %v293_v56 }
  0xc5   :  { %v322_v11 = vrot.slane %v318_v61, 1  ;;  %v323_v12 = vrot.slane %v319_v2, 1  ;;  %v337_v20 = vrot.slane %v333_v13, 2 }
  0xc6   :  { %v352_v59 = vrot.slane %v348_v18, 3  ;;  %v353_v26 = vrot.slane %v349_v19, 3  ;;  %v420_v34 = vpop.permute.xlu0 %419 }
  0xc8   :  { %v262_v41 = vpop.permute.xlu1 %261 }
  0xc9   :  { %v268_v43 = vmul.f32 %v264_v21, %v262_v41  ;;  %v269_v46 = vmul.f32 %v265_v4, %v262_v41  ;;  %v375_v7 = vpop.permute.xlu2 %374  ;;  %v338_v21 = vrot.slane %v334_v14, 2 }
  0xca   :  { %v377_v4 = vperm.slane %v375_v7, 0 }
  0xcb   :  { %v272_v51 = vadd.f32 %v268_v43, %v254_v38  ;;  %v273_v52 = vadd.f32 %v269_v46, %v255_v39 }
  0xcc   :  { %v378_v30 = vmul.f32 %v377_v4, %v292_v55  ;;  %v379_v44 = vmul.f32 %v377_v4, %v293_v56 }
  0xcd   :  { %v681_v48 = vadd.f32 %v286_v47, %v272_v51  ;;  %v683_v49 = vadd.f32 %v287_v50, %v273_v52  ;;  %v422_v47 = vperm.slane %v420_v34, 0 }
  0xce   :  { %v382_v37 = vrot.slane %v378_v30, 5  ;;  %v383_v38 = vrot.slane %v379_v44, 5 }
  0xcf   :  { %v294_v43 = vmax.f32 %v681_v48, 0.0  ;;  %v295_v46 = vmax.f32 %v683_v49, 0.0 }
  0xd1   :  { %v306_v53 = vpop.permute.xlu1 %305  ;;  %v424_v1 = vmul.f32 %v422_v47, %v295_v46 }
  0xd2   :  { %v308_v62 = vperm.slane %v306_v53, 0  ;;  %v405_v25 = vpop.permute.xlu2 %404 }
  0xd3   :  { %v407_v31 = vperm.slane %v405_v25, 0 }
  0xd4   :  { %v309_v5 = vmul.f32 %v308_v62, %v292_v55  ;;  %v310_v6 = vmul.f32 %v308_v62, %v293_v56 }
  0xd5   :  { %v408_v39 = vmul.f32 %v407_v31, %v292_v55  ;;  %v409_v40 = vmul.f32 %v407_v31, %v293_v56 }
  0xd7   :  { %v412_v54 = vrot.slane %v408_v39, 7  ;;  %v413_v57 = vrot.slane %v409_v40, 7 }
  0xd9   :  { %v300_v63 = vpop.permute.xlu1 %299 }
  0xda   :  { %v302_v0 = vperm.slane %v300_v63, 0 }
  0xdc   :  { %v311_v8 = vadd.f32 %v309_v5, %v302_v0  ;;  %v312_v9 = vadd.f32 %v310_v6, %v302_v0  ;;  %v423_v0 = vmul.f32 %v422_v47, %v294_v43 }
  0xde   :  { %v326_v15 = vadd.f32 %v322_v11, %v311_v8  ;;  %v327_v16 = vadd.f32 %v323_v12, %v312_v9  ;;  %v448_v8 = vlaneseq }
  0xe0   :  { %v341_v24 = vadd.f32 %v337_v20, %v326_v15  ;;  %v342_v58 = vadd.f32 %v338_v21, %v327_v16  ;;  %vm450_vm1 = vcmp.lt.s32.totalorder %v448_v8, 256 }
  0xe2   :  { %v360_v17 = vpop.permute.xlu1 %359  ;;  %v356_v45 = vadd.f32 %v352_v59, %v341_v24  ;;  %v357_v32 = vadd.f32 %v353_v26, %v342_v58 }
  0xe3   :  { %v362_v60 = vperm.slane %v360_v17, 0 }
  0xe5   :  { %v363_v22 = vmul.f32 %v362_v60, %v292_v55  ;;  %v364_v23 = vmul.f32 %v362_v60, %v293_v56 }
  0xe7   :  { %v367_v27 = vrot.slane %v363_v22, 4  ;;  %v368_v29 = vrot.slane %v364_v23, 4 }
  0xe9   :  { %v371_v35 = vadd.f32 %v367_v27, %v356_v45  ;;  %v372_v36 = vadd.f32 %v368_v29, %v357_v32 }
  0xeb   :  { %v390_v33 = vpop.permute.xlu1 %389  ;;  %v386_v50 = vadd.f32 %v382_v37, %v371_v35  ;;  %v387_v51 = vadd.f32 %v383_v38, %v372_v36 }
  0xec   :  { %v392_v28 = vperm.slane %v390_v33, 0 }
  0xee   :  { %v393_v41 = vmul.f32 %v392_v28, %v292_v55  ;;  %v394_v42 = vmul.f32 %v392_v28, %v293_v56 }
  0xf0   :  { %v397_v52 = vrot.slane %v393_v41, 6  ;;  %v398_v53 = vrot.slane %v394_v42, 6 }
  0xf2   :  { %v401_v62 = vadd.f32 %v397_v52, %v386_v50  ;;  %v402_v63 = vadd.f32 %v398_v53, %v387_v51 }
  0xf4   :  { %v416_v61 = vadd.f32 %v412_v54, %v401_v62  ;;  %v417_v2 = vadd.f32 %v413_v57, %v402_v63  ;;  %v429_v3 = vpop.permute.xlu1 %428 }
  0xf5   :  { %v431_v55 = vperm.slane %v429_v3, 0 }
  0xf6   :  { %v425_v56 = vadd.f32 %v423_v0, %v416_v61  ;;  %v426_v5 = vadd.f32 %v424_v1, %v417_v2 }
  0xf7   :  { %v432_v48 = vmul.f32 %v431_v55, %v294_v43  ;;  %v433_v6 = vmul.f32 %v431_v55, %v295_v46 }
  0xf9   :  { %v436_v49 = vrot.slane %v432_v48, 1  ;;  %v437_v7 = vrot.slane %v433_v6, 1 }
  0xfb   :  { %v440_v9 = vadd.f32 %v436_v49, %v425_v56  ;;  %v441_v10 = vadd.f32 %v437_v7, %v426_v5 }
  0xfd   :  { %v444_v11 = vrot.slane %v441_v10, 7 }
  0xff   :  { %v446_v12 = vsel %vm445_vm0, %v440_v9, %v444_v11 }
 0x100   :  { %452 = vst.msk [vmem:[#allocation3] sm:$0x3] %vm450_vm1, %v446_v12 }
 0x101   :  { %463 = dma.vmem_to_hbm [thread:$0]  %s459_s17, 32, %s461_s20, [#allocation4]  }
 0x102   :  { %537 = dma.done.wait [#allocation4], 32  }
 0x103   :  { %538 = vsyncadd [#allocation4], 4294967264 }
 0x104   :  { %468 = vsyncpa [#allocation4], 1 }

</bundles_post_ra>
